<compile_context>
chip_gen: v7x
topology: tpu7x:2x2x1
jax: 0.10.0
libtpu: 0.0.40
codegen_flags: <defaults>
</compile_context>

<pallas_src>
import functools

import jax
import jax.numpy as jnp
from jax.experimental import pallas as pl
from jax.experimental.pallas import tpu as pltpu

BN_EPS = 1e-5
LEAKY_SLOPE = 0.2
_LANE = 128
_MROUND = 16  # bf16-friendly sublane granularity for the M axis


def _round_up(x, m):
    return (x + m - 1) // m * m


# ----------------------------------------------------------------------------
# Generation-aware tiling / VMEM configuration (v7x has 64 MiB VMEM per TC).
# ----------------------------------------------------------------------------
@functools.lru_cache(maxsize=None)
def _tpu_config():
    try:
        vmem = getattr(pltpu.get_tpu_info(), "vmem_capacity_bytes", 64 * 2**20)
    except Exception:
        vmem = 64 * 2**20  # conservative fallback
    if vmem <= 64 * 2**20:  # v7x
        return dict(vmem_limit=48 * 2**20, tm_cap=512)
    return dict(vmem_limit=100 * 2**20, tm_cap=1024)  # v5e / v6e (128 MiB)


# ----------------------------------------------------------------------------
# Fused GEMM Pallas kernels (the hot path for every conv in Dense).
# ----------------------------------------------------------------------------
def _apply_act(y, post_act):
    if post_act == "relu":
        return jnp.maximum(y, 0.0)
    if post_act == "leaky":
        return jnp.maximum(y, LEAKY_SLOPE * y)  # single VALU max
    if post_act == "tanh":
        return jnp.tanh(y)
    return y


def _gemm_kernel(x_ref, w_ref, qb_ref, o_ref, *, post_act):
    # bf16 x bf16 -> f32 accumulate on the MXU.
    y = jnp.dot(x_ref[...], w_ref[...], preferred_element_type=jnp.float32)
    y = y + qb_ref[...]
    o_ref[...] = _apply_act(y, post_act).astype(o_ref.dtype)


def _gemm_pre_kernel(x_ref, ps_ref, pb_ref, w_ref, qb_ref, o_ref, *, post_act):
    # BN affine + ReLU in f32 (v5e VPU has no bf16 path); cast to bf16 only at
    # the MXU operand.
    h = x_ref[...].astype(jnp.float32) * ps_ref[...] + pb_ref[...]
    h = jnp.maximum(h, 0.0)
    y = jnp.dot(h.astype(jnp.bfloat16), w_ref[...],
                preferred_element_type=jnp.float32)
    y = y + qb_ref[...]
    o_ref[...] = _apply_act(y, post_act).astype(o_ref.dtype)


def build_gemm_op(w, pre_scale=None, pre_shift=None, post_scale=None,
                  post_shift=None, pre_relu=False, post_act="none"):
    """Fold + pad all static parameters of one fused GEMM exactly once."""
    K, N = w.shape
    w = w.astype(jnp.float32)
    if post_scale is not None:                 # fold post BN scale into weight
        w = w * post_scale.astype(jnp.float32)[None, :]
    qb = (jnp.zeros((N,), jnp.float32) if post_shift is None
          else post_shift.astype(jnp.float32))
    if not pre_relu:
        # a pre-affine with no ReLU folds into the weight / shift as well
        if pre_shift is not None:
            qb = qb + pre_shift.astype(jnp.float32) @ w
        if pre_scale is not None:
            w = w * pre_scale.astype(jnp.float32)[:, None]
        pre_scale = pre_shift = None

    Kp = _round_up(K, _LANE)
    Np = _round_up(N, _LANE)
    wp = jnp.zeros((Kp, Np), jnp.bfloat16).at[:K, :N].set(w.astype(jnp.bfloat16))
    qbp = jnp.zeros((1, Np), jnp.float32).at[0, :N].set(qb)
    op = dict(K=K, N=N, Kp=Kp, Np=Np, w=wp, qb=qbp, post_act=post_act, pre=None)
    if pre_relu:
        ps = jnp.ones((K,), jnp.float32) if pre_scale is None else pre_scale
        pb = jnp.zeros((K,), jnp.float32) if pre_shift is None else pre_shift
        psp = jnp.zeros((1, Kp), jnp.float32).at[0, :K].set(ps)
        pbp = jnp.zeros((1, Kp), jnp.float32).at[0, :K].set(pb)
        op["pre"] = (psp, pbp)
    return op


def apply_gemm(op, x):
    """x: (M, K) activations (any float dtype) -> (M, N) bf16."""
    M, K = x.shape
    assert K == op["K"], (K, op["K"])
    Kp, Np = op["Kp"], op["Np"]
    cfg = _tpu_config()

    Mp = _round_up(M, _MROUND)
    TM = min(Mp, cfg["tm_cap"])
    # Keep >=2 M-steps so the "parallel" axis can shard across v7x's 2 TCs and
    # the DMA pipeline has something to overlap.
    if Mp // TM < 2 and Mp >= 2 * _MROUND:
        TM = _round_up((Mp + 1) // 2, _MROUND)
    Mp = _round_up(Mp, TM)

    TN = Np if Np <= 512 else 512
    if Np % TN:
        TN = Np

    xp = jnp.pad(x.astype(jnp.bfloat16), ((0, Mp - M), (0, Kp - K)))

    grid = (Np // TN, Mp // TM)  # N outer (weight stays resident), M inner
    if op["pre"] is None:
        kern = functools.partial(_gemm_kernel, post_act=op["post_act"])
        in_specs = [
            pl.BlockSpec((TM, Kp), lambda j, i: (i, 0)),
            pl.BlockSpec((Kp, TN), lambda j, i: (0, j)),
            pl.BlockSpec((1, TN), lambda j, i: (0, j)),
        ]
        args = (xp, op["w"], op["qb"])
    else:
        kern = functools.partial(_gemm_pre_kernel, post_act=op["post_act"])
        in_specs = [
            pl.BlockSpec((TM, Kp), lambda j, i: (i, 0)),
            pl.BlockSpec((1, Kp), lambda j, i: (0, 0)),
            pl.BlockSpec((1, Kp), lambda j, i: (0, 0)),
            pl.BlockSpec((Kp, TN), lambda j, i: (0, j)),
            pl.BlockSpec((1, TN), lambda j, i: (0, j)),
        ]
        args = (xp, op["pre"][0], op["pre"][1], op["w"], op["qb"])

    out = pl.pallas_call(
        kern,
        grid=grid,
        in_specs=in_specs,
        out_specs=pl.BlockSpec((TM, TN), lambda j, i: (i, j)),
        out_shape=jax.ShapeDtypeStruct((Mp, Np), jnp.bfloat16),
        compiler_params=pltpu.CompilerParams(
            dimension_semantics=("parallel", "parallel"),
            vmem_limit_bytes=cfg["vmem_limit"]),
    )(*args)
    # TODO(synk): keep activations 128-padded across layers instead of slicing
    # back to exact channel counts (avoids an HBM round trip per layer).
    return out[:M, :op["N"]]


# ----------------------------------------------------------------------------
# Plain-JAX glue: im2col (bf16), pooling, upsampling.
# ----------------------------------------------------------------------------
def im2col(x, kh, kw, stride, pad):
    """x: (N, H, W, C) bf16 -> ((N*Ho*Wo, kh*kw*C), (N, Ho, Wo))."""
    # TODO(synk): patch extraction could be fused into the GEMM kernel with a
    # tap-axis grid + K-accumulator to avoid the kh*kw x HBM blowup entirely;
    # here we at least emit the patch matrix in bf16.
    n, h, w, c = x.shape
    xp = jnp.pad(x, ((0, 0), (pad, pad), (pad, pad), (0, 0)))
    ho = (h + 2 * pad - kh) // stride + 1
    wo = (w + 2 * pad - kw) // stride + 1
    cols = []
    for di in range(kh):
        for dj in range(kw):
            cols.append(xp[:, di:di + stride * ho:stride,
                           dj:dj + stride * wo:stride, :])
    patches = jnp.concatenate(cols, axis=-1)
    return patches.reshape(n * ho * wo, kh * kw * c), (n, ho, wo)


def maxpool_3x3_s2_p1(x):
    # TODO(synk): pooling reduction kept in plain JAX (tiny vs. the GEMMs).
    n, h, w, c = x.shape
    xp = jnp.pad(x, ((0, 0), (1, 1), (1, 1), (0, 0)),
                 constant_values=-jnp.inf)
    ho = (h + 2 - 3) // 2 + 1
    wo = (w + 2 - 3) // 2 + 1
    out = None
    for di in range(3):
        for dj in range(3):
            v = xp[:, di:di + 2 * ho:2, dj:dj + 2 * wo:2, :]
            out = v if out is None else jnp.maximum(out, v)
    return out


def avgpool2(x):
    n, h, w, c = x.shape
    return x.reshape(n, h // 2, 2, w // 2, 2, c).mean(axis=(2, 4)).astype(x.dtype)


def upsample2(x):
    return jnp.repeat(jnp.repeat(x, 2, axis=1), 2, axis=2)


# ----------------------------------------------------------------------------
# Deterministic synthetic parameters (shapes match the PyTorch module),
# pre-folded + pre-padded into GEMM ops at init.
# ----------------------------------------------------------------------------
class KeyGen:
    def __init__(self, key):
        self.key = key

    def __call__(self):
        self.key, sub = jax.random.split(self.key)
        return sub


def make_bn_affine(kg, c):
    gamma = 1.0 + 0.1 * jax.random.normal(kg(), (c,), jnp.float32)
    beta = 0.1 * jax.random.normal(kg(), (c,), jnp.float32)
    mean = 0.1 * jax.random.normal(kg(), (c,), jnp.float32)
    var = 1.0 + 0.1 * jax.random.uniform(kg(), (c,), jnp.float32)
    s = gamma * jax.lax.rsqrt(var + BN_EPS)
    b = beta - mean * s
    return s, b


def make_w(kg, kh, kw, cin, cout):
    fan = kh * kw * cin
    return jax.random.normal(kg(), (kh * kw * cin, cout),
                             jnp.float32) / jnp.sqrt(float(fan))


def build_dense_layer(kg, cin, growth=32, bn_size=4):
    inter = bn_size * growth
    s1, b1 = make_bn_affine(kg, cin)
    w1 = make_w(kg, 1, 1, cin, inter)
    s2, b2 = make_bn_affine(kg, inter)
    w2 = make_w(kg, 3, 3, inter, growth)
    return dict(
        g1=build_gemm_op(w1, pre_scale=s1, pre_shift=b1, pre_relu=True,
                         post_scale=s2, post_shift=b2, post_act="relu"),
        g2=build_gemm_op(w2))


def build_bottleneck(kg, cin, cout):
    inter = cout * 4
    s1, b1 = make_bn_affine(kg, cin)
    w1 = make_w(kg, 1, 1, cin, inter)
    s2, b2 = make_bn_affine(kg, inter)
    w2 = make_w(kg, 3, 3, inter, cout)
    return dict(
        g1=build_gemm_op(w1, pre_scale=s1, pre_shift=b1, pre_relu=True,
                         post_scale=s2, post_shift=b2, post_act="relu"),
        g2=build_gemm_op(w2))


def build_dense_block(kg, cin, nlayers, growth=32):
    return [build_dense_layer(kg, cin + i * growth, growth)
            for i in range(nlayers)]


def build_transition_dn(kg, cin, cout):
    s, b = make_bn_affine(kg, cin)
    w = make_w(kg, 1, 1, cin, cout)
    return build_gemm_op(w, pre_scale=s, pre_shift=b, pre_relu=True)


def build_trans_up(kg, cin, cout):
    # ConvTranspose2d(cin, cout, 1, 1, 0) <=> matmul with (cin, cout) weight.
    s, b = make_bn_affine(kg, cin)
    w = make_w(kg, 1, 1, cin, cout)
    return build_gemm_op(w, pre_scale=s, pre_shift=b, pre_relu=True)


def init_dense_params(key):
    kg = KeyGen(key)
    P = {}
    conv0_w = make_w(kg, 7, 7, 3, 64)
    s0, b0 = make_bn_affine(kg, 64)
    P['conv0'] = build_gemm_op(conv0_w, post_scale=s0, post_shift=b0,
                               post_act="relu")
    P['db1'] = build_dense_block(kg, 64, 6)
    P['tr1'] = build_transition_dn(kg, 256, 128)
    P['db2'] = build_dense_block(kg, 128, 12)
    P['tr2'] = build_transition_dn(kg, 512, 256)
    P['db3'] = build_dense_block(kg, 256, 24)
    P['tr3'] = build_transition_dn(kg, 1024, 512)
    P['db4'] = build_bottleneck(kg, 512, 256)
    P['tb4'] = build_trans_up(kg, 768, 128)
    P['db5'] = build_bottleneck(kg, 384, 256)
    P['tb5'] = build_trans_up(kg, 640, 128)
    P['db6'] = build_bottleneck(kg, 256, 128)
    P['tb6'] = build_trans_up(kg, 384, 64)
    P['db7'] = build_bottleneck(kg, 64, 64)
    P['tb7'] = build_trans_up(kg, 128, 32)
    P['db8'] = build_bottleneck(kg, 32, 32)
    P['tb8'] = build_trans_up(kg, 64, 16)
    refin_w = make_w(kg, 3, 3, 19, 20)
    refin_b = 0.1 * jax.random.normal(kg(), (20,), jnp.float32)
    s20, b20 = make_bn_affine(kg, 20)
    # conv_refin bias folded through batchnorm20: (conv + b)*s + beta.
    P['refin'] = build_gemm_op(refin_w, post_scale=s20,
                               post_shift=refin_b * s20 + b20,
                               post_act="leaky")
    refine3_w = make_w(kg, 3, 3, 20, 3)
    refine3_b = 0.1 * jax.random.normal(kg(), (3,), jnp.float32)
    P['refine3'] = build_gemm_op(refine3_w, post_shift=refine3_b,
                                 post_act="tanh")
    return P


# ----------------------------------------------------------------------------
# Block forward functions (all conv compute goes through apply_gemm).
# ----------------------------------------------------------------------------
def bnrelu_conv1x1_conv3x3(p, x):
    """BN1->ReLU->1x1 conv->BN2->ReLU->3x3 conv (DenseLayer / BottleneckBlock;
    dropRate == 0, so no dropout)."""
    n, h, w, c = x.shape
    g1, g2 = p['g1'], p['g2']
    h1 = apply_gemm(g1, x.reshape(n * h * w, c)).reshape(n, h, w, g1['N'])
    cols, _ = im2col(h1, 3, 3, 1, 1)
    out = apply_gemm(g2, cols)
    return out.reshape(n, h, w, g2['N'])


def dense_block_apply(layers, x):
    for p in layers:
        new = bnrelu_conv1x1_conv3x3(p, x)
        x = jnp.concatenate([x, new], axis=-1)
    return x


def bottleneck_apply(p, x):
    return jnp.concatenate([x, bnrelu_conv1x1_conv3x3(p, x)], axis=-1)


def transition_dn_apply(op, x):
    n, h, w, c = x.shape
    y = apply_gemm(op, x.reshape(n * h * w, c)).reshape(n, h, w, op['N'])
    return avgpool2(y)


def trans_up_apply(op, x):
    n, h, w, c = x.shape
    y = apply_gemm(op, x.reshape(n * h * w, c)).reshape(n, h, w, op['N'])
    return upsample2(y)


def dense_forward(P, x_nchw):
    x = jnp.transpose(x_nchw, (0, 2, 3, 1)).astype(jnp.bfloat16)  # NHWC bf16
    n, H, W, _ = x.shape

    # conv0 (7x7/2, no bias) + norm0 + relu0, then pool0 (maxpool 3x3/2).
    cols, (_, ho, wo) = im2col(x, 7, 7, 2, 3)
    h = apply_gemm(P['conv0'], cols).reshape(n, ho, wo, 64)
    x0 = maxpool_3x3_s2_p1(h)

    x1 = transition_dn_apply(P['tr1'], dense_block_apply(P['db1'], x0))
    x2 = transition_dn_apply(P['tr2'], dense_block_apply(P['db2'], x1))
    x3 = transition_dn_apply(P['tr3'], dense_block_apply(P['db3'], x2))

    x4 = trans_up_apply(P['tb4'], bottleneck_apply(P['db4'], x3))
    x42 = jnp.concatenate([x4, x2], axis=-1)
    x5 = trans_up_apply(P['tb5'], bottleneck_apply(P['db5'], x42))
    x52 = jnp.concatenate([x5, x1], axis=-1)
    x6 = trans_up_apply(P['tb6'], bottleneck_apply(P['db6'], x52))
    x7 = trans_up_apply(P['tb7'], bottleneck_apply(P['db7'], x6))
    x8 = trans_up_apply(P['tb8'], bottleneck_apply(P['db8'], x7))
    x8 = jnp.concatenate([x8, x], axis=-1)  # 16 + 3 = 19 channels

    # conv_refin (3x3, bias) -> batchnorm20 -> LeakyReLU(0.2), folded.
    cols, _ = im2col(x8, 3, 3, 1, 1)
    x9 = apply_gemm(P['refin'], cols).reshape(n, H, W, 20)

    # refine3 (3x3, bias) -> tanh.
    cols, _ = im2col(x9, 3, 3, 1, 1)
    dehaze = apply_gemm(P['refine3'], cols).reshape(n, H, W, 3)
    return jnp.transpose(dehaze.astype(jnp.float32), (0, 3, 1, 2))  # NCHW


if __name__ == "__main__":
    key = jax.random.PRNGKey(0)
    pkey, xkey = jax.random.split(key)
    params = init_dense_params(pkey)
    x = jax.random.normal(xkey, (2, 3, 32, 32), jnp.float32)  # NCHW, /32 divisible
    out = dense_forward(params, x)
    out = jax.block_until_ready(out)
    assert out.shape == (2, 3, 32, 32), out.shape
    assert bool(jnp.all(jnp.isfinite(out)))
    assert bool(jnp.all(jnp.abs(out) <= 1.0 + 1e-6))  # tanh output range
    print("KERNEL_OK")
</pallas_src>

<mosaic_0001>
module attributes {stable_mosaic.version = 11 : i64} {
  func.func @_gemm_kernel(%arg0: i32, %arg1: i32, %arg2: memref<256x256xbf16, #tpu.memory_space<vmem>>, %arg3: memref<256x128xbf16, #tpu.memory_space<vmem>>, %arg4: memref<1x128xf32, #tpu.memory_space<vmem>>, %arg5: memref<256x128xbf16, #tpu.memory_space<vmem>>) attributes {dimension_semantics = [#tpu.dimension_semantics<parallel>, #tpu.dimension_semantics<parallel>], iteration_bounds = array<i64: 1, 2>, scalar_prefetch = 0 : i64, scratch_operands = 0 : i64, tpu.core_type = #tpu.core_type<tc>, window_params = [{transform_indices = @transform_0, window_bounds = array<i64: 256, 256>}, {transform_indices = @transform_1, window_bounds = array<i64: 256, 128>}, {transform_indices = @transform_2, window_bounds = array<i64: 1, 128>}, {transform_indices = @transform_3, window_bounds = array<i64: 256, 128>}]} {
    %c0 = arith.constant 0 : index
    %c0_0 = arith.constant 0 : index
    %0 = vector.load %arg2[%c0, %c0_0] : memref<256x256xbf16, #tpu.memory_space<vmem>>, vector<256x256xbf16>
    %c0_1 = arith.constant 0 : index
    %c0_2 = arith.constant 0 : index
    %1 = vector.load %arg3[%c0_1, %c0_2] : memref<256x128xbf16, #tpu.memory_space<vmem>>, vector<256x128xbf16>
    %cst = arith.constant dense<0.000000e+00> : vector<256x128xf32>
    %2 = tpu.matmul %0, %1, %cst {dimension_numbers = #tpu.dot_dimension_numbers<[1], [0], [0], [1], [0, 0, 1, 1], [], []>} : vector<256x256xbf16>, vector<256x128xbf16>, vector<256x128xf32> -> vector<256x128xf32>
    %c0_3 = arith.constant 0 : index
    %c0_4 = arith.constant 0 : index
    %3 = vector.load %arg4[%c0_3, %c0_4] : memref<1x128xf32, #tpu.memory_space<vmem>>, vector<1x128xf32>
    %4 = vector.broadcast %3 : vector<1x128xf32> to vector<256x128xf32>
    %5 = arith.addf %2, %4 : vector<256x128xf32>
    %cst_5 = arith.constant 0.000000e+00 : f32
    %6 = vector.broadcast %cst_5 : f32 to vector<256x128xf32>
    %7 = arith.maximumf %5, %6 : vector<256x128xf32>
    %8 = arith.truncf %7 : vector<256x128xf32> to vector<256x128xbf16>
    %c0_6 = arith.constant 0 : index
    %c0_7 = arith.constant 0 : index
    %9 = vector.load %arg5[%c0_6, %c0_7] : memref<256x128xbf16, #tpu.memory_space<vmem>>, vector<256x128xbf16>
    tpu.vector_store %arg5[%c0_6, %c0_7], %8 {strides = array<i32>} : memref<256x128xbf16, #tpu.memory_space<vmem>>, vector<256x128xbf16>,
    return
  }
  func.func @transform_0(%arg0: i32, %arg1: i32) -> (i32, i32) {
    %c0_i32 = arith.constant 0 : i32
    %c0_i32_0 = arith.constant 0 : i32
    return %arg1, %c0_i32 : i32, i32
  }
  func.func @transform_1(%arg0: i32, %arg1: i32) -> (i32, i32) {
    %c0_i32 = arith.constant 0 : i32
    %c0_i32_0 = arith.constant 0 : i32
    return %c0_i32, %arg0 : i32, i32
  }
  func.func @transform_2(%arg0: i32, %arg1: i32) -> (i32, i32) {
    %c0_i32 = arith.constant 0 : i32
    %c0_i32_0 = arith.constant 0 : i32
    return %c0_i32, %arg0 : i32, i32
  }
  func.func @transform_3(%arg0: i32, %arg1: i32) -> (i32, i32) {
    %c0_i32 = arith.constant 0 : i32
    return %arg1, %arg0 : i32, i32
  }
}

</mosaic_0001>

<bundles_post_ra>
// kernel: tpu_custom_call.1
= control target key start
LH: loop header
LB: loop body
LE: loop exit
PB: predicated region body
PF: predicated region fallthrough
CT: control target
= control target key end

     0   :  { %8 = vsyncpa [#allocation3], 0  ;;  %s2031_s0 = inlined_call_operand.hbm [shape: bf16[512,256], index: 0, kind: input, shape index: {}]   ;;  %s2032_s1 = inlined_call_operand.hbm [shape: bf16[256,128], index: 1, kind: input, shape index: {}]   ;;  %s2033_s2 = inlined_call_operand.vmem [shape: f32[1,128], index: 2, kind: input, shape index: {}]   ;;  %s2034_s3 = inlined_call_operand.hbm [shape: bf16[512,128], index: 3, kind: output, shape index: {}]  }
   0x1   :  { %10 = vsyncpa [#allocation3 + $0x1], 0 }
   0x2   :  { %11 = vsyncpa [#allocation6], 0 }
   0x3   :  { %12 = vsyncpa [#allocation4], 0 }
   0x4   :  { %14 = vsyncpa [#allocation4 + $0x1], 0  ;;  %s1721_s12 = smov 0   ;;  %s1723_s13 = smov 0  }
   0x5   :  { %s1725_s14 = smov 0   ;;  %s1727_s15 = smov 0  }
   0x6   :  { %s1729_s16 = smov 0   ;;  %s1731_s17 = smov 0  }
   0x7 LB: > { %s1045_s18 = sadd.s32 4294967295, %s1690_s17   ;;  %s1046_s19 = sadd.s32 4294967294, %s1690_s17   ;;  %s1690_s17 = sphi %s1731_s17, %s20_s17   ;;  %s1686_s16 = sphi %s1729_s16, %s2058_s16   ;;  %s1682_s15 = sphi %s1727_s15, %s2057_s15   ;;  %s1678_s14 = sphi %s1725_s14, %s2056_s14   ;;  %s1674_s13 = sphi %s1723_s13, %s2055_s13   ;;  %s1670_s12 = sphi %s1721_s12, %s2054_s12  }
   0x8   : > { %p52_p0 = scmp.ne.s32.totalorder %s1674_s13, %s1670_s12  ;;  %p1755_p1 = scmp.eq.s32.totalorder %s1045_s18, 0 }
   0x9   : > { %p1759_p2 = scmp.eq.s32.totalorder %s1045_s18, 1  ;;  %p136_p3 = scmp.eq.s32.totalorder %s1046_s19, 1 }
   0xa   : > { %s2039_s20 = scalar_select %p1755_p1, 1, 0 }
   0xb   : > { %s2040_s21 = scalar_select %p1759_p2, 1, 0 }
   0xc   : > { %p1765_p4 = por %p1755_p1, %p52_p0  ;;  %p1047_p5 = scmp.ge.s32.totalorder %s1690_s17, 1 }
   0xd   : > { %p1770_p6 = por %p136_p3, %p52_p0  ;;  %p143_p7 = scmp.lt.s32.totalorder %s1690_s17, 3 }
   0xe   : > { %s2041_s22 = scalar_select %p1765_p4, 1, 0 }
   0xf   : > { %s2042_s23 = scalar_select %p1770_p6, 1, 0 }
  0x10   : > { %p1775_p8 = pnand %p1047_p5, %p143_p7  ;;  %s1692_s25 = smov [#allocation5]  }
  0x11   : > { %s157_s26 = sshll.u32 %s1692_s25, 4  ;;  %s29_s28 = sadd.s32 1, %s1686_s16  ;;  %s158_s26 = int_to_ptr.vmem [resolvable:$true] %s157_s26 }
  0x12   : > { %s2043_s24 = scalar_select %p1775_p8, 1, 0 }
  0x13   : > { %p1411_p9 = pneg %p1775_p8  ;;  %s1546_s4 = scalar_lea.hbm %s2032_s1, 2048 }
  0x14   : > { %p1547_p12 = scmp.ne.s32.totalorder %s2032_s1, %s1546_s4  ;;  %p1553_p5 = scmp.lt.u32.totalorder %s1546_s4, %s2032_s1 }
  0x15   : > { %p1784_p11 = pnand %p1411_p9, %p1755_p1 }
  0x17   : > { %p1548_p13 = pneg %p1784_p11 }
  0x19   : > { %p1549_p0 = pnand %p1548_p13, %p1547_p12 }
  0x1b   : > { %p1550_p3 = pneg %p1549_p0 }
  0x1d   : > { %p1555_p7 = pnand %p1553_p5, %p1550_p3 }
  0x1f   : > { %1558 = shalt.err (!%p1555_p7)
}
  0x20   : > { %s1559_s9 = scalar_lea.vmem %s158_s26, 2048  ;;  %p1567_p1 = scmp.lt.s32.totalorder %s158_s26, %s158_s26 }
  0x21   : > { %p1560_p9 = scmp.ne.s32.totalorder %s158_s26, %s1559_s9  ;;  %p1568_p4 = scmp.lt.s32.totalorder %s1559_s9, %s1559_s9 }
  0x23   : > { %p1562_p10 = pnand %p1560_p9, %p1548_p13  ;;  %p1569_p8 = por %p1568_p4, %p1567_p1 }
  0x25   : > { %p1563_p6 = pneg %p1562_p10 }
  0x27   : > { %p1570_p2 = pnand %p1569_p8, %p1563_p6 }
  0x29   : > { %1573 = shalt.err (!%p1570_p2)
}
  0x2a   : > { %s1693_s10 = smov 64   ;;  %s1694_s11 = smov 4  }
  0x2b   : > { %1414 = dma.hbm_to_vmem [thread:$0]  (!%p1784_p11), %s2032_s1, 2048, %s158_s26, [#allocation6], %s1693_s10, %s1693_s10, %s1694_s11  }
  0x2c   : > { %p30_p1 = scmp.ge.s32.totalorder %s29_s28, 2  ;;  %s39_s25 = sadd.s32 1, %s1678_s14 }
  0x2d   : > { %p46_p2 = scmp.ne.s32.totalorder %s1678_s14, %s1674_s13  ;;  %p47_p4 = scmp.eq.s32.totalorder %s1690_s17, 0 }
  0x2e   : > { %s2060_s28 = smov (%p30_p1, %s29_s28), 0  ;;  %p2046_p8 = scmp.ne.s32.totalorder %s2040_s21, 0 }
  0x2f   : > { %p1811_p6 = por %p47_p4, %p46_p2  ;;  %s36_s27 = ssub.s32 %s1686_s16, %s2060_s28 }
  0x30   : > { %p1817_p10 = por %p2046_p8, %p46_p2  ;;  %p1424_p12 = scmp.lt.s32.totalorder %s1690_s17, 2 }
  0x31   : > { %p37_p11 = scmp.eq.s32.totalorder %s36_s27, 0  ;;  %s177_s26 = sand.u32 1, %s1678_s14  }
  0x32   : > { %s1051_s4 = sshll.u32 %s177_s26, 8  ;;  %s1146_s6 = sshll.u32 %s1686_s16, 12 }
  0x33   : > { %s1826_s5 = scalar_select %p37_p11, %s1678_s14, %s39_s25  }
  0x34   : > { %s1832_s9 = scalar_lea.hbm %s2031_s0, %s1146_s6  ;;  %s181_s21 = scalar_lea.vmem [#allocation2], %s1051_s4 }
  0x35   : > { %s189_s10 = sshll.u32 %s181_s21, 4  ;;  %p1838_p13 = pnand %p1424_p12, %p1811_p6  ;;  %s1834_s10 = int_to_ptr.vmem [resolvable:$true] %s189_s10 }
  0x36   : > { %s1842_s18 = scalar_lea.sflag [#allocation3], %s177_s26  ;;  %s1574_s19 = scalar_lea.hbm %s1832_s9, 4096 }
  0x37   : > { %p1575_p0 = scmp.ne.s32.totalorder %s1832_s9, %s1574_s19  ;;  %p1576_p3 = pneg %p1838_p13 }
  0x38   : > { %s1579_s29 = scalar_lea.hbm %s2031_s0, 8192  ;;  %p1580_p9 = scmp.lt.u32.totalorder %s1832_s9, %s2031_s0 }
  0x39   : > { %p1577_p5 = pnand %p1576_p3, %p1575_p0  ;;  %p1581_p1 = scmp.lt.u32.totalorder %s1579_s29, %s1574_s19 }
  0x3a   : > { %p1583_p4 = scmp.lt.u32.totalorder %s1574_s19, %s1832_s9 }
  0x3b   : > { %p1578_p7 = pneg %p1577_p5  ;;  %p1582_p2 = por %p1581_p1, %p1580_p9 }
  0x3d   : > { %p1584_p6 = por %p1583_p4, %p1582_p2 }
  0x3f   : > { %p1585_p8 = pnand %p1584_p6, %p1578_p7 }
  0x41   : > { %1588 = shalt.err (!%p1585_p8)
}
  0x42   : > { %s1589_s26 = scalar_lea.vmem %s1834_s10, 4096  ;;  %s1695_s7 = smov [#allocation2]  }
  0x43   : > { %p1590_p12 = scmp.ne.s32.totalorder %s1834_s10, %s1589_s26  ;;  %s1594_s8 = sshll.u32 %s1695_s7, 4  ;;  %s1595_s8 = int_to_ptr.vmem [resolvable:$false] %s1594_s8 }
  0x44   : > { %s1596_s21 = scalar_lea.vmem %s1595_s8, 8192  ;;  %p1597_p5 = scmp.lt.s32.totalorder %s1834_s10, %s1595_s8 }
  0x45   : > { %p1592_p11 = pnand %p1590_p12, %p1576_p3  ;;  %p1598_p9 = scmp.lt.s32.totalorder %s1596_s21, %s1589_s26 }
  0x47   : > { %p1593_p0 = pneg %p1592_p11  ;;  %p1599_p1 = por %p1598_p9, %p1597_p5 }
  0x49   : > { %p1600_p2 = pnand %p1599_p1, %p1593_p0 }
  0x4b   : > { %1603 = shalt.err (!%p1600_p2)
}
  0x4c   : > { %s1696_s19 = smov 128   ;;  %s1697_s25 = smov 8  }
  0x4d   : > { %1418 = dma.hbm_to_vmem [thread:$0]  (!%p1838_p13), %s1832_s9, 4096, %s1834_s10, %s1842_s18, %s1696_s19, %s1696_s19, %s1697_s25  }
  0x4e   : > { %p2049_p3 = scmp.ne.s32.totalorder %s2043_s24, 0 }
  0x4f   : > { %s1873_s27 = sand.u32 (!%p2049_p3), 1, %s1674_s13   ;;  %p2050_p7 = scmp.ne.s32.totalorder (!%p2049_p3), %s2041_s22, 0 }
  0x50   : > { %201 = sbr.rel (%p2049_p3) target bundleno = 419 (0x1a3), region = 32  ;;  %s1056_s29 = sshll.u32 (!%p2049_p3), %s1873_s27, 8 }
  0x51   : > { %s204_s4 = scalar_lea.sflag (!%p2049_p3), [#allocation3], %s1873_s27  ;;  %s1877_s6 = scalar_lea.vmem (!%p2049_p3), [#allocation2], %s1056_s29 }
  0x57   : > { %1657 = dma.done.wait (%p2050_p7), %s204_s4, 4096  }
  0x58   : > { %1659 = vsyncadd (%p2050_p7), %s204_s4, 4294963200  ;;  %p2051_p13 = scmp.ne.s32.totalorder %s2039_s20, 0 }
  0x5a   : > { %1661 = dma.done.wait (%p2051_p13), [#allocation6], 2048  }
  0x5b   : > { %1663 = vsyncadd (%p2051_p13), [#allocation6], 4294965248  ;;  %v1482_v0 = vld [vmem:[#allocation5 + $0x40] sm:$0xff]   ;;  %v1484_v2 = vld [vmem:[#allocation5 + $0x48] sm:$0xff]   ;;  %s1058_s24 = sshll.u32 %s1873_s27, 7  ;;  %s1179_s10 = sshll.u32 %s1682_s15, 11 }
  0x5c   : > { %v1483_v1 = vld [vmem:[#allocation5] sm:$0xff]   ;;  %1275 = vmatprep.subr.bf16.mxu0 %v1482_v0  ;;  %1387 = vmatprep.subr.bf16.mxu1 %v1482_v0  ;;  %v1485_v3 = vld [vmem:[#allocation5 + $0x8] sm:$0xff]   ;;  %v1486_v4 = vld [vmem:[#allocation5 + $0x50] sm:$0xff]   ;;  %s1929_s9 = scalar_lea.vmem [#allocation7], %s1058_s24  ;;  %s1978_s7 = scalar_lea.hbm %s2034_s3, %s1179_s10 }
  0x5d   : > { %1276 = vmatpush3.bf16.msra.mxu0 %v1483_v1  ;;  %1395 = vmatpush3.bf16.msra.mxu1 %v1483_v1  ;;  %v1487_v5 = vld [vmem:[#allocation5 + $0x10] sm:$0xff]   ;;  %v1488_v6 = vld [vmem:[#allocation5 + $0x58] sm:$0xff]   ;;  %v1490_v8 = vld [vmem:[#allocation5 + $0x60] sm:$0xff]   ;;  %s938_s11 = sshll.u32 %s1929_s9, 4  ;;  %s924_s15 = scalar_lea.sflag [#allocation4], %s1873_s27  ;;  %s1980_s11 = int_to_ptr.vmem [resolvable:$true] %s938_s11 }
  0x5e   : > { %1277 = vmatprep.subr.bf16.mxu0 %v1484_v2  ;;  %1388 = vmatprep.subr.bf16.mxu1 %v1484_v2  ;;  %v1489_v7 = vld [vmem:[#allocation5 + $0x18] sm:$0xff]   ;;  %v1491_v9 = vld [vmem:[#allocation5 + $0x20] sm:$0xff]   ;;  %v1492_v10 = vld [vmem:[#allocation5 + $0x68] sm:$0xff]   ;;  %s1604_s8 = scalar_lea.vmem %s1980_s11, 2048  ;;  %s1698_s21 = smov [#allocation7]  }
  0x5f   : > { %v1500_v11 = vld [vmem:[%s1877_s6 + $0x4] ss:$8 sps:$4 sm:$0xff]   ;;  %v1494_v14 = vld [vmem:[#allocation5 + $0x70] sm:$0xff]   ;;  %v1496_v16 = vld [vmem:[#allocation5 + $0x78] sm:$0xff]   ;;  %p1605_p4 = scmp.ne.s32.totalorder %s1980_s11, %s1604_s8  ;;  %s1608_s19 = sshll.u32 %s1698_s21, 4  ;;  %s1609_s19 = int_to_ptr.vmem [resolvable:$false] %s1608_s19 }
  0x60   : > { %v1503_v12 = vld [vmem:[%s1877_s6 + $0x84] ss:$8 sps:$4 sm:$0xff]   ;;  %602 = vmatprep.mubr.bf16.mxu0 %v1500_v11  ;;  %v1495_v15 = vld [vmem:[#allocation5 + $0x30] sm:$0xff]   ;;  %v1497_v17 = vld [vmem:[#allocation5 + $0x38] sm:$0xff]   ;;  %s1610_s25 = scalar_lea.vmem %s1609_s19, 4096  ;;  %p1611_p12 = scmp.lt.s32.totalorder %s1980_s11, %s1609_s19 }
  0x61   : > { %1278 = vmatpush3.bf16.msra.mxu0 %v1485_v3  ;;  %1396 = vmatpush3.bf16.msra.mxu1 %v1485_v3  ;;  %v1493_v13 = vld [vmem:[#allocation5 + $0x28] sm:$0xff]   ;;  %v1504_v20 = vld [vmem:[%s1877_s6 + $0x14] ss:$8 sps:$4 sm:$0xff]   ;;  %v1508_v22 = vld [vmem:[%s1877_s6 + $0x10] ss:$8 sps:$4 sm:$0xff]   ;;  %p1606_p6 = pnand %p1605_p4, %p1817_p10  ;;  %p1612_p11 = scmp.lt.s32.totalorder %s1610_s25, %s1604_s8 }
  0x62   : > { %1279 = vmatprep.subr.bf16.mxu0 %v1486_v4  ;;  %1389 = vmatprep.subr.bf16.mxu1 %v1486_v4  ;;  %v1498_v18 = vld [vmem:[%s1877_s6] ss:$8 sps:$4 sm:$0xff]   ;;  %v1506_v21 = vld [vmem:[%s1877_s6 + $0x94] ss:$8 sps:$4 sm:$0xff]   ;;  %v1509_v23 = vld [vmem:[%s1877_s6 + $0x90] ss:$8 sps:$4 sm:$0xff]  }
  0x63   : > { %666 = vmatprep.mubr.bf16.mxu1 %v1503_v12  ;;  %v1501_v19 = vld [vmem:[%s1877_s6 + $0x80] ss:$8 sps:$4 sm:$0xff]   ;;  %v1510_v24 = vld [vmem:[%s1877_s6 + $0x24] ss:$8 sps:$4 sm:$0xff]   ;;  %v1516_v28 = vld [vmem:[%s1877_s6 + $0x34] ss:$8 sps:$4 sm:$0xff]   ;;  %p1607_p8 = pneg %p1606_p6  ;;  %p1613_p0 = por %p1612_p11, %p1611_p12 }
  0x64   : > { %v1512_v25 = vld [vmem:[%s1877_s6 + $0xa4] ss:$8 sps:$4 sm:$0xff]   ;;  %v1514_v26 = vld [vmem:[%s1877_s6 + $0x20] ss:$8 sps:$4 sm:$0xff]   ;;  %v1518_v29 = vld [vmem:[%s1877_s6 + $0xb4] ss:$8 sps:$4 sm:$0xff]  }
  0x65   : > { %1280 = vmatpush3.bf16.msra.mxu0 %v1487_v5  ;;  %1397 = vmatpush3.bf16.msra.mxu1 %v1487_v5  ;;  %v1515_v27 = vld [vmem:[%s1877_s6 + $0xa0] ss:$8 sps:$4 sm:$0xff]   ;;  %v1520_v30 = vld [vmem:[%s1877_s6 + $0x30] ss:$8 sps:$4 sm:$0xff]   ;;  %v1522_v32 = vld [vmem:[%s1877_s6 + $0x44] ss:$8 sps:$4 sm:$0xff]   ;;  %p1614_p5 = pnand %p1613_p0, %p1607_p8 }
  0x66   : > { %1281 = vmatprep.subr.bf16.mxu0 %v1488_v6  ;;  %1390 = vmatprep.subr.bf16.mxu1 %v1488_v6  ;;  %v1521_v31 = vld [vmem:[%s1877_s6 + $0xb0] ss:$8 sps:$4 sm:$0xff]   ;;  %v1524_v33 = vld [vmem:[%s1877_s6 + $0xc4] ss:$8 sps:$4 sm:$0xff]   ;;  %v1526_v34 = vld [vmem:[%s1877_s6 + $0x40] ss:$8 sps:$4 sm:$0xff]  }
  0x67   : > { %v1527_v35 = vld [vmem:[%s1877_s6 + $0xc0] ss:$8 sps:$4 sm:$0xff]   ;;  %v1528_v36 = vld [vmem:[%s1877_s6 + $0x54] ss:$8 sps:$4 sm:$0xff]   ;;  %v1532_v38 = vld [vmem:[%s1877_s6 + $0x50] ss:$8 sps:$4 sm:$0xff]  }
  0x68   : > { %v1530_v37 = vld [vmem:[%s1877_s6 + $0xd4] ss:$8 sps:$4 sm:$0xff]   ;;  %v1533_v39 = vld [vmem:[%s1877_s6 + $0xd0] ss:$8 sps:$4 sm:$0xff]   ;;  %v1534_v40 = vld [vmem:[%s1877_s6 + $0x64] ss:$8 sps:$4 sm:$0xff]  }
  0x69   : > { %1282 = vmatpush3.bf16.msra.mxu0 %v1489_v7  ;;  %1398 = vmatpush3.bf16.msra.mxu1 %v1489_v7  ;;  %v1536_v41 = vld [vmem:[%s1877_s6 + $0xe4] ss:$8 sps:$4 sm:$0xff]   ;;  %v1538_v42 = vld [vmem:[%s1877_s6 + $0x60] ss:$8 sps:$4 sm:$0xff]   ;;  %v1540_v44 = vld [vmem:[%s1877_s6 + $0x74] ss:$8 sps:$4 sm:$0xff]  }
  0x6a   : > { %1283 = vmatprep.subr.bf16.mxu0 %v1490_v8  ;;  %1391 = vmatprep.subr.bf16.mxu1 %v1490_v8  ;;  %v1539_v43 = vld [vmem:[%s1877_s6 + $0xe0] ss:$8 sps:$4 sm:$0xff]   ;;  %v1542_v45 = vld [vmem:[%s1877_s6 + $0xf4] ss:$8 sps:$4 sm:$0xff]   ;;  %v1544_v46 = vld [vmem:[%s1877_s6 + $0x70] ss:$8 sps:$4 sm:$0xff]  }
  0x6b   : > { %v1545_v47 = vld [vmem:[%s1877_s6 + $0xf0] ss:$8 sps:$4 sm:$0xff]   ;;  %v1922_v50 = vld [vmem:[%s2033_s2] ss:$0 sm:$0xff] }
  0x6d   : > { %1284 = vmatpush3.bf16.msra.mxu0 %v1491_v9  ;;  %1399 = vmatpush3.bf16.msra.mxu1 %v1491_v9 }
  0x6e   : > { %1285 = vmatprep.subr.bf16.mxu0 %v1492_v10  ;;  %1392 = vmatprep.subr.bf16.mxu1 %v1492_v10 }
  0x71   : > { %1286 = vmatpush3.bf16.msra.mxu0 %v1493_v13  ;;  %1400 = vmatpush3.bf16.msra.mxu1 %v1493_v13 }
  0x72   : > { %1287 = vmatprep.subr.bf16.mxu0 %v1494_v14  ;;  %1393 = vmatprep.subr.bf16.mxu1 %v1494_v14 }
  0x75   : > { %1288 = vmatpush3.bf16.msra.mxu0 %v1495_v15  ;;  %1401 = vmatpush3.bf16.msra.mxu1 %v1495_v15 }
  0x76   : > { %1289 = vmatprep.subr.bf16.mxu0 %v1496_v16  ;;  %1394 = vmatprep.subr.bf16.mxu1 %v1496_v16 }
  0x79   : > { %1290 = vmatpush3.bf16.msra.mxu0 %v1497_v17  ;;  %1402 = vmatpush3.bf16.msra.mxu1 %v1497_v17 }
  0x7c   : > { %603 = vmatmul.mubr.bf16.vlgmr.msra.gmra.mrb[0].mxu0 %v1498_v18  ;;  %667 = vmatmul.mubr.bf16.vlgmr.msra.gmra.mrb[0].mxu1 %v1501_v19 }
  0x7d   : > { %610 = vmatprep.mubr.bf16.mxu0 %v1504_v20  ;;  %674 = vmatprep.mubr.bf16.mxu1 %v1506_v21 }
  0x84   : > { %611 = vmatmul.mubr.bf16.gmra.mrb[4].mxu0 %v1508_v22  ;;  %675 = vmatmul.mubr.bf16.gmra.mrb[4].mxu1 %v1509_v23 }
  0x85   : > { %618 = vmatprep.mubr.bf16.mxu0 %v1510_v24  ;;  %682 = vmatprep.mubr.bf16.mxu1 %v1512_v25 }
  0x8c   : > { %619 = vmatmul.mubr.bf16.gmra.mrb[8].mxu0 %v1514_v26  ;;  %683 = vmatmul.mubr.bf16.gmra.mrb[8].mxu1 %v1515_v27 }
  0x8d   : > { %626 = vmatprep.mubr.bf16.mxu0 %v1516_v28  ;;  %690 = vmatprep.mubr.bf16.mxu1 %v1518_v29 }
  0x94   : > { %627 = vmatmul.mubr.bf16.gmra.mrb[12].mxu0 %v1520_v30  ;;  %691 = vmatmul.mubr.bf16.gmra.mrb[12].mxu1 %v1521_v31 }
  0x95   : > { %634 = vmatprep.mubr.bf16.mxu0 %v1522_v32  ;;  %698 = vmatprep.mubr.bf16.mxu1 %v1524_v33 }
  0x9c   : > { %635 = vmatmul.mubr.bf16.gmra.mrb[16].mxu0 %v1526_v34  ;;  %699 = vmatmul.mubr.bf16.gmra.mrb[16].mxu1 %v1527_v35 }
  0x9d   : > { %642 = vmatprep.mubr.bf16.mxu0 %v1528_v36  ;;  %706 = vmatprep.mubr.bf16.mxu1 %v1530_v37 }
  0xa4   : > { %643 = vmatmul.mubr.bf16.gmra.mrb[20].mxu0 %v1532_v38  ;;  %707 = vmatmul.mubr.bf16.gmra.mrb[20].mxu1 %v1533_v39 }
  0xa5   : > { %650 = vmatprep.mubr.bf16.mxu0 %v1534_v40  ;;  %714 = vmatprep.mubr.bf16.mxu1 %v1536_v41 }
  0xac   : > { %651 = vmatmul.mubr.bf16.gmra.mrb[24].mxu0 %v1538_v42  ;;  %715 = vmatmul.mubr.bf16.gmra.mrb[24].mxu1 %v1539_v43 }
  0xad   : > { %658 = vmatprep.mubr.bf16.mxu0 %v1540_v44  ;;  %722 = vmatprep.mubr.bf16.mxu1 %v1542_v45 }
  0xb4   : > { %659 = vmatmul.mubr.bf16.gmra.mrb[28].mxu0 %v1544_v46  ;;  %723 = vmatmul.mubr.bf16.gmra.mrb[28].mxu1 %v1545_v47 }
 0x14f   : > { %v1291_v48 = vpop.f32.mrb[0].mxu0  ;;  %v1339_v49 = vpop.f32.mrb[0].mxu1 }
 0x150   : > { %v1292_v51 = vpop.f32.mrb[1].mxu0  ;;  %v1340_v52 = vpop.f32.mrb[1].mxu1 }
 0x151   : > { %v1293_v53 = vadd.f32 %v1292_v51, %v1291_v48  ;;  %v1341_v54 = vadd.f32 %v1340_v52, %v1339_v49  ;;  %v1294_v55 = vpop.f32.mrb[2].mxu0  ;;  %v1342_v56 = vpop.f32.mrb[2].mxu1 }
 0x152   : > { %v1295_v57 = vpop.f32.mrb[3].mxu0  ;;  %v1343_v58 = vpop.f32.mrb[3].mxu1 }
 0x153   : > { %v605_v59 = vadd.f32 %v1293_v53, %v1922_v50  ;;  %v669_v60 = vadd.f32 %v1341_v54, %v1922_v50  ;;  %v1296_v61 = vadd.f32 %v1295_v57, %v1294_v55  ;;  %v1344_v62 = vadd.f32 %v1343_v58, %v1342_v56 }
 0x155   : > { %v608_v63 = vadd.f32 %v1296_v61, %v1922_v50  ;;  %v672_v0 = vadd.f32 %v1344_v62, %v1922_v50  ;;  %v731_v1 = vmax.f32 %v605_v59, 0.0  ;;  %v747_v2 = vmax.f32 %v669_v60, 0.0 }
 0x157   : > { %v732_v3 = vmax.f32 %v608_v63, 0.0  ;;  %v748_v4 = vmax.f32 %v672_v0, 0.0  ;;  %v1297_v5 = vpop.f32.mrb[4].mxu0  ;;  %v1345_v6 = vpop.f32.mrb[4].mxu1 }
 0x158   : > { %v1298_v7 = vpop.f32.mrb[5].mxu0  ;;  %v1346_v8 = vpop.f32.mrb[5].mxu1 }
 0x159   : > { %v1183_v9 = vpack.c.bf16 %v732_v3, %v731_v1  ;;  %v1223_v10 = vpack.c.bf16 %v748_v4, %v747_v2  ;;  %v1299_v11 = vadd.f32 %v1298_v7, %v1297_v5  ;;  %v1347_v12 = vadd.f32 %v1346_v8, %v1345_v6  ;;  %v1300_v13 = vpop.f32.mrb[6].mxu0  ;;  %v1348_v14 = vpop.f32.mrb[6].mxu1 }
 0x15a   : > { %v1301_v15 = vpop.f32.mrb[7].mxu0  ;;  %v1349_v16 = vpop.f32.mrb[7].mxu1 }
 0x15b   : > { %1184 = vst [vmem:[%s1929_s9] sm:$0xff] %v1183_v9   ;;  %1267 = vst [vmem:[%s1929_s9 + $0x40] sm:$0xff] %v1223_v10   ;;  %v613_v17 = vadd.f32 %v1299_v11, %v1922_v50  ;;  %v677_v18 = vadd.f32 %v1347_v12, %v1922_v50  ;;  %v1302_v19 = vadd.f32 %v1301_v15, %v1300_v13 }
 0x15c   : > { %v1350_v20 = vadd.f32 %v1349_v16, %v1348_v14 }
 0x15d   : > { %v616_v21 = vadd.f32 %v1302_v19, %v1922_v50  ;;  %v733_v23 = vmax.f32 %v613_v17, 0.0  ;;  %v749_v24 = vmax.f32 %v677_v18, 0.0 }
 0x15e   : > { %v680_v22 = vadd.f32 %v1350_v20, %v1922_v50 }
 0x15f   : > { %v734_v25 = vmax.f32 %v616_v21, 0.0  ;;  %v1303_v27 = vpop.f32.mrb[8].mxu0  ;;  %v1351_v28 = vpop.f32.mrb[8].mxu1 }
 0x160   : > { %v750_v26 = vmax.f32 %v680_v22, 0.0  ;;  %v1304_v29 = vpop.f32.mrb[9].mxu0  ;;  %v1352_v30 = vpop.f32.mrb[9].mxu1 }
 0x161   : > { %v1188_v31 = vpack.c.bf16 %v734_v25, %v733_v23  ;;  %v1305_v33 = vadd.f32 %v1304_v29, %v1303_v27  ;;  %v1353_v34 = vadd.f32 %v1352_v30, %v1351_v28  ;;  %v1306_v35 = vpop.f32.mrb[10].mxu0  ;;  %v1354_v36 = vpop.f32.mrb[10].mxu1 }
 0x162   : > { %v1228_v32 = vpack.c.bf16 %v750_v26, %v749_v24  ;;  %v1307_v37 = vpop.f32.mrb[11].mxu0  ;;  %v1355_v38 = vpop.f32.mrb[11].mxu1 }
 0x163   : > { %1260 = vst [vmem:[%s1929_s9 + $0x8] sm:$0xff] %v1188_v31   ;;  %v621_v39 = vadd.f32 %v1305_v33, %v1922_v50  ;;  %v685_v40 = vadd.f32 %v1353_v34, %v1922_v50  ;;  %v1308_v41 = vadd.f32 %v1307_v37, %v1306_v35  ;;  %v1356_v42 = vadd.f32 %v1355_v38, %v1354_v36 }
 0x164   : > { %1268 = vst [vmem:[%s1929_s9 + $0x48] sm:$0xff] %v1228_v32  }
 0x165   : > { %v624_v43 = vadd.f32 %v1308_v41, %v1922_v50  ;;  %v688_v44 = vadd.f32 %v1356_v42, %v1922_v50  ;;  %v735_v45 = vmax.f32 %v621_v39, 0.0  ;;  %v751_v46 = vmax.f32 %v685_v40, 0.0 }
 0x167   : > { %v736_v47 = vmax.f32 %v624_v43, 0.0  ;;  %v752_v48 = vmax.f32 %v688_v44, 0.0  ;;  %v1309_v49 = vpop.f32.mrb[12].mxu0  ;;  %v1357_v51 = vpop.f32.mrb[12].mxu1 }
 0x168   : > { %v1310_v52 = vpop.f32.mrb[13].mxu0  ;;  %v1358_v53 = vpop.f32.mrb[13].mxu1 }
 0x169   : > { %v1193_v54 = vpack.c.bf16 %v736_v47, %v735_v45  ;;  %v1233_v55 = vpack.c.bf16 %v752_v48, %v751_v46  ;;  %v1311_v56 = vadd.f32 %v1310_v52, %v1309_v49  ;;  %v1359_v57 = vadd.f32 %v1358_v53, %v1357_v51  ;;  %v1312_v58 = vpop.f32.mrb[14].mxu0  ;;  %v1360_v59 = vpop.f32.mrb[14].mxu1 }
 0x16a   : > { %v1313_v60 = vpop.f32.mrb[15].mxu0  ;;  %v1361_v61 = vpop.f32.mrb[15].mxu1 }
 0x16b   : > { %1261 = vst [vmem:[%s1929_s9 + $0x10] sm:$0xff] %v1193_v54   ;;  %1269 = vst [vmem:[%s1929_s9 + $0x50] sm:$0xff] %v1233_v55   ;;  %v629_v62 = vadd.f32 %v1311_v56, %v1922_v50  ;;  %v693_v63 = vadd.f32 %v1359_v57, %v1922_v50  ;;  %v1314_v0 = vadd.f32 %v1313_v60, %v1312_v58 }
 0x16c   : > { %v1362_v1 = vadd.f32 %v1361_v61, %v1360_v59 }
 0x16d   : > { %v632_v2 = vadd.f32 %v1314_v0, %v1922_v50  ;;  %v737_v4 = vmax.f32 %v629_v62, 0.0  ;;  %v753_v5 = vmax.f32 %v693_v63, 0.0 }
 0x16e   : > { %v696_v3 = vadd.f32 %v1362_v1, %v1922_v50 }
 0x16f   : > { %v738_v6 = vmax.f32 %v632_v2, 0.0  ;;  %v1315_v8 = vpop.f32.mrb[16].mxu0  ;;  %v1363_v9 = vpop.f32.mrb[16].mxu1 }
 0x170   : > { %v754_v7 = vmax.f32 %v696_v3, 0.0  ;;  %v1316_v10 = vpop.f32.mrb[17].mxu0  ;;  %v1364_v11 = vpop.f32.mrb[17].mxu1 }
 0x171   : > { %v1198_v12 = vpack.c.bf16 %v738_v6, %v737_v4  ;;  %v1317_v14 = vadd.f32 %v1316_v10, %v1315_v8  ;;  %v1365_v15 = vadd.f32 %v1364_v11, %v1363_v9  ;;  %v1318_v16 = vpop.f32.mrb[18].mxu0  ;;  %v1366_v17 = vpop.f32.mrb[18].mxu1 }
 0x172   : > { %v1238_v13 = vpack.c.bf16 %v754_v7, %v753_v5  ;;  %v1319_v18 = vpop.f32.mrb[19].mxu0  ;;  %v1367_v19 = vpop.f32.mrb[19].mxu1 }
 0x173   : > { %1262 = vst [vmem:[%s1929_s9 + $0x18] sm:$0xff] %v1198_v12   ;;  %v637_v20 = vadd.f32 %v1317_v14, %v1922_v50  ;;  %v701_v21 = vadd.f32 %v1365_v15, %v1922_v50  ;;  %v1320_v22 = vadd.f32 %v1319_v18, %v1318_v16  ;;  %v1368_v23 = vadd.f32 %v1367_v19, %v1366_v17 }
 0x174   : > { %1270 = vst [vmem:[%s1929_s9 + $0x58] sm:$0xff] %v1238_v13  }
 0x175   : > { %v640_v24 = vadd.f32 %v1320_v22, %v1922_v50  ;;  %v704_v25 = vadd.f32 %v1368_v23, %v1922_v50  ;;  %v739_v26 = vmax.f32 %v637_v20, 0.0  ;;  %v755_v27 = vmax.f32 %v701_v21, 0.0 }
 0x177   : > { %v740_v28 = vmax.f32 %v640_v24, 0.0  ;;  %v756_v29 = vmax.f32 %v704_v25, 0.0  ;;  %v1321_v30 = vpop.f32.mrb[20].mxu0  ;;  %v1369_v31 = vpop.f32.mrb[20].mxu1 }
 0x178   : > { %v1322_v32 = vpop.f32.mrb[21].mxu0  ;;  %v1370_v33 = vpop.f32.mrb[21].mxu1 }
 0x179   : > { %v1203_v34 = vpack.c.bf16 %v740_v28, %v739_v26  ;;  %v1243_v35 = vpack.c.bf16 %v756_v29, %v755_v27  ;;  %v1323_v36 = vadd.f32 %v1322_v32, %v1321_v30  ;;  %v1371_v37 = vadd.f32 %v1370_v33, %v1369_v31  ;;  %v1324_v38 = vpop.f32.mrb[22].mxu0  ;;  %v1372_v39 = vpop.f32.mrb[22].mxu1 }
 0x17a   : > { %v1325_v40 = vpop.f32.mrb[23].mxu0  ;;  %v1373_v41 = vpop.f32.mrb[23].mxu1 }
 0x17b   : > { %1263 = vst [vmem:[%s1929_s9 + $0x20] sm:$0xff] %v1203_v34   ;;  %1271 = vst [vmem:[%s1929_s9 + $0x60] sm:$0xff] %v1243_v35   ;;  %v645_v42 = vadd.f32 %v1323_v36, %v1922_v50  ;;  %v709_v43 = vadd.f32 %v1371_v37, %v1922_v50  ;;  %v1326_v44 = vadd.f32 %v1325_v40, %v1324_v38 }
 0x17c   : > { %v1374_v45 = vadd.f32 %v1373_v41, %v1372_v39 }
 0x17d   : > { %v648_v46 = vadd.f32 %v1326_v44, %v1922_v50  ;;  %v741_v48 = vmax.f32 %v645_v42, 0.0  ;;  %v757_v49 = vmax.f32 %v709_v43, 0.0 }
 0x17e   : > { %v712_v47 = vadd.f32 %v1374_v45, %v1922_v50 }
 0x17f   : > { %v742_v51 = vmax.f32 %v648_v46, 0.0  ;;  %v1327_v53 = vpop.f32.mrb[24].mxu0  ;;  %v1375_v54 = vpop.f32.mrb[24].mxu1 }
 0x180   : > { %v758_v52 = vmax.f32 %v712_v47, 0.0  ;;  %v1328_v55 = vpop.f32.mrb[25].mxu0  ;;  %v1376_v56 = vpop.f32.mrb[25].mxu1 }
 0x181   : > { %v1208_v57 = vpack.c.bf16 %v742_v51, %v741_v48  ;;  %v1329_v59 = vadd.f32 %v1328_v55, %v1327_v53  ;;  %v1377_v60 = vadd.f32 %v1376_v56, %v1375_v54  ;;  %v1330_v61 = vpop.f32.mrb[26].mxu0  ;;  %v1378_v62 = vpop.f32.mrb[26].mxu1 }
 0x182   : > { %v1248_v58 = vpack.c.bf16 %v758_v52, %v757_v49  ;;  %v1331_v63 = vpop.f32.mrb[27].mxu0  ;;  %v1379_v0 = vpop.f32.mrb[27].mxu1 }
 0x183   : > { %1264 = vst [vmem:[%s1929_s9 + $0x28] sm:$0xff] %v1208_v57   ;;  %v653_v1 = vadd.f32 %v1329_v59, %v1922_v50  ;;  %v717_v2 = vadd.f32 %v1377_v60, %v1922_v50  ;;  %v1332_v3 = vadd.f32 %v1331_v63, %v1330_v61  ;;  %v1380_v4 = vadd.f32 %v1379_v0, %v1378_v62 }
 0x184   : > { %1272 = vst [vmem:[%s1929_s9 + $0x68] sm:$0xff] %v1248_v58  }
 0x185   : > { %v656_v5 = vadd.f32 %v1332_v3, %v1922_v50  ;;  %v720_v6 = vadd.f32 %v1380_v4, %v1922_v50  ;;  %v743_v7 = vmax.f32 %v653_v1, 0.0  ;;  %v759_v8 = vmax.f32 %v717_v2, 0.0 }
 0x187   : > { %v744_v9 = vmax.f32 %v656_v5, 0.0  ;;  %v760_v10 = vmax.f32 %v720_v6, 0.0  ;;  %v1333_v11 = vpop.f32.mrb[28].mxu0  ;;  %v1381_v12 = vpop.f32.mrb[28].mxu1 }
 0x188   : > { %v1334_v13 = vpop.f32.mrb[29].mxu0  ;;  %v1382_v14 = vpop.f32.mrb[29].mxu1 }
 0x189   : > { %v1213_v15 = vpack.c.bf16 %v744_v9, %v743_v7  ;;  %v1253_v16 = vpack.c.bf16 %v760_v10, %v759_v8  ;;  %v1335_v17 = vadd.f32 %v1334_v13, %v1333_v11  ;;  %v1383_v18 = vadd.f32 %v1382_v14, %v1381_v12  ;;  %v1336_v19 = vpop.f32.mrb[30].mxu0  ;;  %v1384_v20 = vpop.f32.mrb[30].mxu1 }
 0x18a   : > { %v1337_v21 = vpop.f32.mrb[31].mxu0  ;;  %v1385_v22 = vpop.f32.mrb[31].mxu1 }
 0x18b   : > { %1265 = vst [vmem:[%s1929_s9 + $0x30] sm:$0xff] %v1213_v15   ;;  %1273 = vst [vmem:[%s1929_s9 + $0x70] sm:$0xff] %v1253_v16   ;;  %v661_v23 = vadd.f32 %v1335_v17, %v1922_v50  ;;  %v725_v24 = vadd.f32 %v1383_v18, %v1922_v50  ;;  %v1338_v25 = vadd.f32 %v1337_v21, %v1336_v19 }
 0x18c   : > { %v1386_v26 = vadd.f32 %v1385_v22, %v1384_v20 }
 0x18d   : > { %v664_v27 = vadd.f32 %v1338_v25, %v1922_v50  ;;  %v745_v29 = vmax.f32 %v661_v23, 0.0  ;;  %v761_v30 = vmax.f32 %v725_v24, 0.0 }
 0x18e   : > { %v728_v28 = vadd.f32 %v1386_v26, %v1922_v50 }
 0x18f   : > { %v746_v31 = vmax.f32 %v664_v27, 0.0 }
 0x190   : > { %v762_v32 = vmax.f32 %v728_v28, 0.0 }
 0x191   : > { %v1218_v33 = vpack.c.bf16 %v746_v31, %v745_v29 }
 0x192   : > { %v1258_v34 = vpack.c.bf16 %v762_v32, %v761_v30 }
 0x193   : > { %1266 = vst [vmem:[%s1929_s9 + $0x38] sm:$0xff] %v1218_v33  }
 0x194   : > { %1274 = vst [vmem:[%s1929_s9 + $0x78] sm:$0xff] %v1258_v34  }
 0x195   : > { %1617 = shalt.err (!%p1614_p5)
}
 0x196   : > { %s1618_s29 = scalar_lea.hbm %s1978_s7, 2048  ;;  %s1622_s20 = scalar_lea.hbm %s2034_s3, 4096 }
 0x197   : > { %p1619_p9 = scmp.ne.s32.totalorder %s1978_s7, %s1618_s29  ;;  %p1623_p3 = scmp.lt.u32.totalorder %s1978_s7, %s2034_s3 }
 0x198   : > { %p1624_p7 = scmp.lt.u32.totalorder %s1622_s20, %s1618_s29  ;;  %p1626_p4 = scmp.lt.u32.totalorder %s1618_s29, %s1978_s7 }
 0x199   : > { %p1620_p1 = pnand %p1619_p9, %p1817_p10 }
 0x19a   : > { %p1625_p13 = por %p1624_p7, %p1623_p3 }
 0x19b   : > { %p1621_p2 = pneg %p1620_p1 }
 0x19c   : > { %p1627_p6 = por %p1626_p4, %p1625_p13 }
 0x19e   : > { %p1628_p8 = pnand %p1627_p6, %p1621_p2 }
 0x1a0   : > { %1631 = shalt.err (!%p1628_p8)
}
 0x1a1   : > { %s1699_s9 = smov 64   ;;  %s1700_s10 = smov 4  }
 0x1a2   : > { %1409 = dma.vmem_to_hbm [thread:$0]  (%p1817_p10), %s1980_s11, 2048, %s1978_s7, %s924_s15, %s1699_s9, %s1699_s9, %s1700_s10  }
 0x1a3 PF: > { %s953_s18 = sand.u32 1, %s1670_s12   ;;  %p2052_p12 = scmp.ne.s32.totalorder %s2042_s23, 0 }
 0x1a4   : > { %p2053_p11 = scmp.ge.s32.totalorder %s1690_s17, 2  ;;  %s954_s26 = scalar_lea.sflag [#allocation4], %s953_s18 }
 0x1a6   : > { %p1420_p0 = pnand %p2053_p11, %p2052_p12 }
 0x1a8   : > { %1665 = dma.done.wait (!%p1420_p0), %s954_s26, 2048  }
 0x1a9   : > { %1667 = vsyncadd (!%p1420_p0), %s954_s26, 4294965248  ;;  %s20_s17 = sadd.s32 1, %s1690_s17   ;;  %s2054_s12 = smov %s1674_s13 }
 0x1aa   : > { %p17_p5 = scmp.ge.s32.totalorder %s20_s17, 4   ;;  %s2055_s13 = smov %s1678_s14 }
 0x1ab   : > { %s2056_s14 = smov %s1826_s5  ;;  %s2057_s15 = smov %s1686_s16 }
 0x1ac   : > { %s2058_s16 = smov %s2060_s28  ;;  %19 = sbr.rel (!%p17_p5) target bundleno = 7 (0x7), region = 85 }
 0x1b3   :  { %959 = vsyncpa [#allocation3], 1 }
 0x1b4   :  { %961 = vsyncpa [#allocation3 + $0x1], 1 }
 0x1b5   :  { %962 = vsyncpa [#allocation6], 1 }
 0x1b6   :  { %963 = vsyncpa [#allocation4], 1 }
 0x1b7   :  { %965 = vsyncpa [#allocation4 + $0x1], 1 }

</bundles_post_ra>
